<compile_context>
chip_gen: v5e
topology: v5e:2x2
jax: 0.10.0
libtpu: 0.0.40
codegen_flags: <defaults>
</compile_context>

<pallas_src>
import jax
import jax.numpy as jnp
from jax import lax
from jax.experimental import pallas as pl
from jax.experimental.pallas import tpu as pltpu

CONSTRAINT_LAMBDA = 0.25   # parameters.constraint_coefficient_lambda (deterministic)
MAX_TILE_ROWS = 2048       # 1 MiB f32 tile per input -> near HBM roofline plateau
NUM_CORE_SPLITS = 2        # leading "parallel" axis -> both TensorCores on v7x


def _round_up(x, m):
    return ((x + m - 1) // m) * m


def _make_loss_kernel(lam, inv_n, steps, use_selector):
    """Kernel: fused scaled-MSE + constraint accumulation over row tiles."""

    def kernel(*refs):
        if use_selector:
            x_ref, y_ref, s_ref, sel_ref, o_ref, acc_ref = refs
        else:
            x_ref, y_ref, s_ref, o_ref, acc_ref = refs
            sel_ref = None

        step = pl.program_id(1)

        @pl.when(step == 0)
        def _():
            acc_ref[...] = jnp.zeros_like(acc_ref)

        x = x_ref[...].astype(jnp.float32)   # (TILE, LANES)
        y = y_ref[...].astype(jnp.float32)   # (TILE, LANES)
        s = s_ref[...].astype(jnp.float32)   # (1, LANES), VMEM-resident constant

        # --- scaled MSE term (single elementwise pass + reduce) ----------------
        d = x - y
        mse_rows = jnp.sum(s * (d * d), axis=1, keepdims=True)        # (TILE, 1)

        # --- constraint term: sum over samples of (sum_c x)^2 ------------------
        if use_selector:
            # selector matmul gives each folded sample's component sum (idle MXU).
            g = jnp.dot(x, sel_ref[...],
                        preferred_element_type=jnp.float32,
                        precision=lax.Precision.HIGHEST)               # (TILE, 128)
            c_rows = jnp.sum(g * g, axis=1, keepdims=True)             # (TILE, 1)
        else:
            gs = jnp.sum(x, axis=1, keepdims=True)                     # (TILE, 1)
            c_rows = gs * gs

        acc_ref[...] += jnp.sum(mse_rows + lam * c_rows, axis=0, keepdims=True)

        @pl.when(step == steps - 1)
        def _():
            # lane-dense (8,128) broadcast store: unmasked vst, written back once
            # per split when the output block index advances.
            o_ref[...] = jnp.broadcast_to(acc_ref[...] * inv_n, o_ref.shape)

    return kernel


def constraint_adapted_loss_scaled(inp, target, scaling_factors,
                                   lam=CONSTRAINT_LAMBDA,
                                   max_tile_rows=MAX_TILE_ROWS):
    """inp/target: (N, C); scaling_factors: (C,). Returns scalar f32 loss."""
    N, C = inp.shape
    assert target.shape == (N, C)
    assert scaling_factors.shape == (C,)

    # ---- lane-dense folding: pack 128//C samples per 128-lane row ------------
    if C < 128 and 128 % C == 0:
        fold = 128 // C
    else:
        fold = 1
    lanes = fold * C

    rows_raw = -(-N // fold)                               # folded rows needed
    splits = NUM_CORE_SPLITS if rows_raw >= 16 * NUM_CORE_SPLITS else 1
    per_split = -(-rows_raw // splits)
    tile = min(max_tile_rows, _round_up(per_split, 16))    # multiple of 16 rows
    steps = -(-per_split // tile)
    rows = splits * steps * tile
    n_pad = rows * fold

    # ---- zero-pad the batch tail (contributes 0 to both sums) ----------------
    pad = n_pad - N
    if pad:
        inp_p = jnp.concatenate([inp, jnp.zeros((pad, C), inp.dtype)], axis=0)
        target_p = jnp.concatenate([target, jnp.zeros((pad, C), target.dtype)], axis=0)
    else:
        inp_p, target_p = inp, target

    x2 = inp_p.reshape(rows, lanes)
    y2 = target_p.reshape(rows, lanes)
    s2 = jnp.tile(scaling_factors.astype(jnp.float32).reshape(1, C), (1, fold))

    operands = [x2, y2, s2]
    in_specs = [
        pl.BlockSpec((tile, lanes), lambda c, i: (c * steps + i, 0)),
        pl.BlockSpec((tile, lanes), lambda c, i: (c * steps + i, 0)),
        pl.BlockSpec((1, lanes), lambda c, i: (0, 0)),     # DMA'd once, resident
    ]

    use_selector = fold > 1
    if use_selector:
        # (lanes, 128) 0/1 selector: column g sums the C lanes of sample-slot g.
        lane_idx = jnp.arange(lanes)[:, None]
        col_idx = jnp.arange(128)[None, :]
        sel = ((lane_idx // C) == col_idx).astype(jnp.float32)
        operands.append(sel)
        in_specs.append(pl.BlockSpec((lanes, 128), lambda c, i: (0, 0)))

    out = pl.pallas_call(
        _make_loss_kernel(float(lam), 1.0 / N, steps, use_selector),
        out_shape=jax.ShapeDtypeStruct((splits, 8, 128), jnp.float32),
        grid_spec=pltpu.PrefetchScalarGridSpec(
            num_scalar_prefetch=0,
            grid=(splits, steps),
            in_specs=in_specs,
            out_specs=pl.BlockSpec((1, 8, 128), lambda c, i: (c, 0, 0)),
            scratch_shapes=[pltpu.VMEM((1, 1), jnp.float32)],
        ),
        compiler_params=pltpu.CompilerParams(
            dimension_semantics=("parallel", "arbitrary"),
            vmem_limit_bytes=32 * 1024 * 1024,
        ),
    )(*operands)

    # each split wrote its partial (already /N and lam-scaled) lane-densely
    return jnp.sum(out[:, 0, 0])


def _reference(inp, target, scaling_factors, lam=CONSTRAINT_LAMBDA):
    inp = inp.astype(jnp.float32)
    target = target.astype(jnp.float32)
    mse = jnp.mean((inp - target) ** 2, axis=0)
    mse = jnp.dot(scaling_factors.astype(jnp.float32), mse)
    g = jnp.sum(inp, axis=1) ** 2
    return mse + lam * jnp.mean(g)


if __name__ == "__main__":
    key = jax.random.PRNGKey(0)

    def check(N, C, max_tile_rows=MAX_TILE_ROWS, tag=0):
        k1, k2 = jax.random.split(jax.random.fold_in(key, tag))
        inp = jax.random.normal(k1, (N, C), dtype=jnp.float32)
        target = jax.random.normal(k2, (N, C), dtype=jnp.float32)
        scaling = 0.5 + jnp.arange(C, dtype=jnp.float32) / C
        out = constraint_adapted_loss_scaled(inp, target, scaling,
                                             max_tile_rows=max_tile_rows)
        out = jax.block_until_ready(out)
        ref = _reference(inp, target, scaling)
        assert jnp.allclose(out, ref, rtol=1e-4, atol=1e-4), (N, C, out, ref)

    check(8, 4, tag=0)                         # small-shape path (heavy zero-pad)
    check(2048, 32, tag=1)                     # lane-dense fold=4, 2-way split, no padding
    check(1000, 32, tag=2)                     # fold=4 with zero-padded batch tail
    check(2048, 32, max_tile_rows=64, tag=3)   # multi-step accumulation along the grid
    check(200, 48, tag=4)                      # fallback path: C does not divide 128

    print("KERNEL_OK")
</pallas_src>

<mosaic_0001>
module attributes {stable_mosaic.version = 11 : i64} {
  func.func @kernel(%arg0: i32, %arg1: i32, %arg2: memref<16x128xf32, #tpu.memory_space<vmem>>, %arg3: memref<16x128xf32, #tpu.memory_space<vmem>>, %arg4: memref<1x128xf32, #tpu.memory_space<vmem>>, %arg5: memref<128x128xf32, #tpu.memory_space<vmem>>, %arg6: memref<1x8x128xf32, #tpu.memory_space<vmem>>, %arg7: memref<1x1xf32, #tpu.memory_space<vmem>>) attributes {dimension_semantics = [#tpu.dimension_semantics<parallel>, #tpu.dimension_semantics<arbitrary>], iteration_bounds = array<i64: 1, 1>, scalar_prefetch = 0 : i64, scratch_operands = 1 : i64, tpu.core_type = #tpu.core_type<tc>, window_params = [{transform_indices = @transform_0, window_bounds = array<i64: 16, 128>}, {transform_indices = @transform_1, window_bounds = array<i64: 16, 128>}, {pipeline_mode = #tpu.pipeline_mode<synchronous>, transform_indices = @transform_2, window_bounds = array<i64: 1, 128>}, {pipeline_mode = #tpu.pipeline_mode<synchronous>, transform_indices = @transform_3, window_bounds = array<i64: 128, 128>}, {transform_indices = @transform_4, window_bounds = array<i64: 1, 8, 128>}]} {
    %c0_i32 = arith.constant 0 : i32
    %0 = arith.cmpi eq, %arg1, %c0_i32 : i32
    %1 = arith.extui %0 : i1 to i32
    %c0_i32_0 = arith.constant 0 : i32
    %2 = arith.cmpi ne, %1, %c0_i32_0 : i32
    scf.if %2 {
      %cst_18 = arith.constant 0.000000e+00 : f32
      %28 = vector.broadcast %cst_18 : f32 to vector<1x1xf32>
      %c0_19 = arith.constant 0 : index
      %c0_20 = arith.constant 0 : index
      %29 = vector.load %arg7[%c0_19, %c0_20] : memref<1x1xf32, #tpu.memory_space<vmem>>, vector<1x1xf32>
      tpu.vector_store %arg7[%c0_19, %c0_20], %28 {strides = array<i32>} : memref<1x1xf32, #tpu.memory_space<vmem>>, vector<1x1xf32>,
    } else {
    }
    %c0 = arith.constant 0 : index
    %c0_1 = arith.constant 0 : index
    %3 = vector.load %arg2[%c0, %c0_1] : memref<16x128xf32, #tpu.memory_space<vmem>>, vector<16x128xf32>
    %c0_2 = arith.constant 0 : index
    %c0_3 = arith.constant 0 : index
    %4 = vector.load %arg3[%c0_2, %c0_3] : memref<16x128xf32, #tpu.memory_space<vmem>>, vector<16x128xf32>
    %c0_4 = arith.constant 0 : index
    %c0_5 = arith.constant 0 : index
    %5 = vector.load %arg4[%c0_4, %c0_5] : memref<1x128xf32, #tpu.memory_space<vmem>>, vector<1x128xf32>
    %6 = arith.subf %3, %4 : vector<16x128xf32>
    %7 = arith.mulf %6, %6 : vector<16x128xf32>
    %8 = vector.broadcast %5 : vector<1x128xf32> to vector<16x128xf32>
    %9 = arith.mulf %8, %7 : vector<16x128xf32>
    %cst = arith.constant dense<0.000000e+00> : vector<16xf32>
    %10 = vector.multi_reduction <add>, %9, %cst [1] : vector<16x128xf32> to vector<16xf32>
    %11 = vector.shape_cast %10 : vector<16xf32> to vector<16x1xf32>
    %c0_6 = arith.constant 0 : index
    %c0_7 = arith.constant 0 : index
    %12 = vector.load %arg5[%c0_6, %c0_7] : memref<128x128xf32, #tpu.memory_space<vmem>>, vector<128x128xf32>
    %cst_8 = arith.constant dense<0.000000e+00> : vector<16x128xf32>
    %13 = tpu.matmul %3, %12, %cst_8 {dimension_numbers = #tpu.dot_dimension_numbers<[1], [0], [0], [1], [0, 0, 1, 1], [], []>, precision = #tpu.contract_precision<fp32>} : vector<16x128xf32>, vector<128x128xf32>, vector<16x128xf32> -> vector<16x128xf32>
    %14 = arith.mulf %13, %13 : vector<16x128xf32>
    %cst_9 = arith.constant dense<0.000000e+00> : vector<16xf32>
    %15 = vector.multi_reduction <add>, %14, %cst_9 [1] : vector<16x128xf32> to vector<16xf32>
    %16 = vector.shape_cast %15 : vector<16xf32> to vector<16x1xf32>
    %c0_10 = arith.constant 0 : index
    %c0_11 = arith.constant 0 : index
    %17 = vector.load %arg7[%c0_10, %c0_11] : memref<1x1xf32, #tpu.memory_space<vmem>>, vector<1x1xf32>
    %cst_12 = arith.constant 2.500000e-01 : f32
    %18 = vector.broadcast %cst_12 : f32 to vector<16x1xf32>
    %19 = arith.mulf %18, %16 : vector<16x1xf32>
    %20 = arith.addf %11, %19 : vector<16x1xf32>
    %cst_13 = arith.constant dense<0.000000e+00> : vector<1xf32>
    %21 = vector.multi_reduction <add>, %20, %cst_13 [0] : vector<16x1xf32> to vector<1xf32>
    %22 = vector.shape_cast %21 : vector<1xf32> to vector<1x1xf32>
    %23 = arith.addf %17, %22 : vector<1x1xf32>
    %c0_14 = arith.constant 0 : index
    %c0_15 = arith.constant 0 : index
    %24 = vector.load %arg7[%c0_14, %c0_15] : memref<1x1xf32, #tpu.memory_space<vmem>>, vector<1x1xf32>
    tpu.vector_store %arg7[%c0_14, %c0_15], %23 {strides = array<i32>} : memref<1x1xf32, #tpu.memory_space<vmem>>, vector<1x1xf32>,
    %c0_i32_16 = arith.constant 0 : i32
    %25 = arith.cmpi eq, %arg1, %c0_i32_16 : i32
    %26 = arith.extui %25 : i1 to i32
    %c0_i32_17 = arith.constant 0 : i32
    %27 = arith.cmpi ne, %26, %c0_i32_17 : i32
    scf.if %27 {
      %c0_18 = arith.constant 0 : index
      %c0_19 = arith.constant 0 : index
      %28 = vector.load %arg7[%c0_18, %c0_19] : memref<1x1xf32, #tpu.memory_space<vmem>>, vector<1x1xf32>
      %cst_20 = arith.constant 1.250000e-01 : f32
      %29 = vector.broadcast %cst_20 : f32 to vector<1x1xf32>
      %30 = arith.mulf %28, %29 : vector<1x1xf32>
      %31 = vector.shape_cast %30 : vector<1x1xf32> to vector<1x1x1xf32>
      %32 = vector.broadcast %31 : vector<1x1x1xf32> to vector<1x8x128xf32>
      %c0_21 = arith.constant 0 : index
      %c0_22 = arith.constant 0 : index
      %c0_23 = arith.constant 0 : index
      %33 = vector.load %arg6[%c0_21, %c0_22, %c0_23] : memref<1x8x128xf32, #tpu.memory_space<vmem>>, vector<1x8x128xf32>
      tpu.vector_store %arg6[%c0_21, %c0_22, %c0_23], %32 {strides = array<i32>} : memref<1x8x128xf32, #tpu.memory_space<vmem>>, vector<1x8x128xf32>,
    } else {
    }
    return
  }
  func.func @transform_0(%arg0: i32, %arg1: i32) -> (i32, i32) {
    %c1_i32 = arith.constant 1 : i32
    %0 = arith.muli %arg0, %c1_i32 : i32
    %1 = arith.addi %0, %arg1 : i32
    %c0_i32 = arith.constant 0 : i32
    %c0_i32_0 = arith.constant 0 : i32
    return %1, %c0_i32 : i32, i32
  }
  func.func @transform_1(%arg0: i32, %arg1: i32) -> (i32, i32) {
    %c1_i32 = arith.constant 1 : i32
    %0 = arith.muli %arg0, %c1_i32 : i32
    %1 = arith.addi %0, %arg1 : i32
    %c0_i32 = arith.constant 0 : i32
    %c0_i32_0 = arith.constant 0 : i32
    return %1, %c0_i32 : i32, i32
  }
  func.func @transform_2(%arg0: i32, %arg1: i32) -> (i32, i32) {
    %c0_i32 = arith.constant 0 : i32
    %c0_i32_0 = arith.constant 0 : i32
    %c0_i32_1 = arith.constant 0 : i32
    return %c0_i32, %c0_i32_0 : i32, i32
  }
  func.func @transform_3(%arg0: i32, %arg1: i32) -> (i32, i32) {
    %c0_i32 = arith.constant 0 : i32
    %c0_i32_0 = arith.constant 0 : i32
    %c0_i32_1 = arith.constant 0 : i32
    return %c0_i32, %c0_i32_0 : i32, i32
  }
  func.func @transform_4(%arg0: i32, %arg1: i32) -> (i32, i32, i32) {
    %c0_i32 = arith.constant 0 : i32
    %c0_i32_0 = arith.constant 0 : i32
    %c0_i32_1 = arith.constant 0 : i32
    return %arg0, %c0_i32, %c0_i32_0 : i32, i32, i32
  }
}

</mosaic_0001>

<bundles_post_ra>
// kernel: tpu_custom_call.1
= control target key start
LH: loop header
LB: loop body
LE: loop exit
PB: predicated region body
PF: predicated region fallthrough
CT: control target
= control target key end

     0   :  { %9 = vsyncpa [#allocation4], 0  ;;  %s949_s0 = inlined_call_operand.hbm [shape: f32[16,128], index: 0, kind: input, shape index: {}]   ;;  %s950_s1 = inlined_call_operand.hbm [shape: f32[16,128], index: 1, kind: input, shape index: {}]   ;;  %s951_s2 = inlined_call_operand.vmem [shape: f32[1,128], index: 2, kind: input, shape index: {}]   ;;  %s952_s3 = inlined_call_operand.hbm [shape: f32[128,128], index: 3, kind: input, shape index: {}]   ;;  %s953_s4 = inlined_call_operand.hbm [shape: f32[1,8,128], index: 4, kind: output, shape index: {}]  }
   0x1   :  { %10 = vsyncpa [#allocation7], 0 }
   0x2   :  { %11 = vsyncpa [#allocation5], 0  ;;  %s37_s17 = sshll.u32 %s950_s1, 4  ;;  %s685_s18 = smov [#allocation6]   ;;  %s38_s17 = int_to_ptr.hbm [resolvable:$true] %s37_s17 }
   0x3   :  { %s39_s19 = sshll.u32 %s685_s18, 4  ;;  %s20_s22 = sshll.u32 %s949_s0, 4  ;;  %s40_s19 = int_to_ptr.vmem [resolvable:$true] %s39_s19  ;;  %s21_s22 = int_to_ptr.hbm [resolvable:$true] %s20_s22 }
   0x4   :  { %s686_s23 = smov 128   ;;  %s687_s24 = smov 8  }
   0x5   :  { %45 = dma.hbm_to_vmem [thread:$0]  %s38_s17, 256, %s40_s19, [#allocation7], %s686_s23, %s686_s23, %s687_s24  }
   0x6   :  { %s688_s25 = smov [#allocation3]   ;;  %s52_s29 = sshll.u32 %s952_s3, 4  ;;  %s53_s29 = int_to_ptr.hbm [resolvable:$true] %s52_s29 }
   0x7   :  { %s22_s26 = sshll.u32 %s688_s25, 4  ;;  %s689_s1 = smov [#allocation8]   ;;  %s23_s26 = int_to_ptr.vmem [resolvable:$true] %s22_s26 }
   0x8   :  { %28 = dma.hbm_to_vmem [thread:$0]  %s21_s22, 256, %s23_s26, [#allocation4], %s686_s23, %s686_s23, %s687_s24  }
   0x9   :  { %s54_s30 = sshll.u32 %s689_s1, 4  ;;  %s55_s30 = int_to_ptr.vmem [resolvable:$true] %s54_s30 }
   0xa   :  { %60 = dma.hbm_to_vmem [thread:$0]  %s53_s29, 2048, %s55_s30, [#allocation7], %s686_s23, %s686_s23, %s687_s24  }
   0xb   :  { %679 = dma.done.wait [#allocation4], 256  }
   0xc   :  { %680 = vsyncadd [#allocation4], 4294967040 }
   0xd   :  { %681 = dma.done.wait [#allocation7], 2304  }
   0xe   :  { %682 = vsyncadd [#allocation7], 4294964992  ;;  %v116_v0 = vld [vmem:[#allocation8 + $0x78] sm:$0xff]  ;;  %v115_v1 = vld [vmem:[#allocation8 + $0x70] sm:$0xff]  ;;  %vm81_vm0 = vcmask 0   ;;  %s529_s8 = sshll.u32 %s953_s4, 4  ;;  %s530_s8 = int_to_ptr.hbm [resolvable:$true] %s529_s8 }
   0xf   :  { %v114_v2 = vld [vmem:[#allocation8 + $0x68] sm:$0xff]  ;;  %v727_v3 = vand.u32 4294901760, %v116_v0  ;;  %v729_v4 = vand.u32 4294901760, %v115_v1  ;;  %v113_v6 = vld [vmem:[#allocation8 + $0x60] sm:$0xff]  ;;  %v112_v7 = vld [vmem:[#allocation8 + $0x58] sm:$0xff] }
  0x10   :  { %v731_v5 = vand.u32 4294901760, %v114_v2  ;;  %v111_v8 = vld [vmem:[#allocation8 + $0x50] sm:$0xff]  ;;  %v733_v9 = vand.u32 4294901760, %v113_v6  ;;  %v735_v10 = vand.u32 4294901760, %v112_v7  ;;  %v110_v12 = vld [vmem:[#allocation8 + $0x48] sm:$0xff]  ;;  %v109_v13 = vld [vmem:[#allocation8 + $0x40] sm:$0xff] }
  0x11   :  { %v737_v11 = vand.u32 4294901760, %v111_v8  ;;  %118 = vmatpush.msra.mxu0 %v727_v3  ;;  %v167_v14 = vsub.f32 %v116_v0, %v727_v3  ;;  %v173_v15 = vsub.f32 %v115_v1, %v729_v4  ;;  %331 = vmatpush.msra.mxu3 %v727_v3  ;;  %v744_v17 = vand.u32 4294901760, %v110_v12  ;;  %v108_v18 = vld [vmem:[#allocation8 + $0x38] sm:$0xff]  ;;  %v107_v26 = vld [vmem:[#allocation8 + $0x30] sm:$0xff]  ;;  %v106_v36 = vld [vmem:[#allocation8 + $0x28] sm:$0xff] }
  0x12   :  { %v179_v16 = vsub.f32 %v114_v2, %v731_v5  ;;  %v185_v19 = vsub.f32 %v113_v6, %v733_v9  ;;  %v191_v20 = vsub.f32 %v112_v7, %v735_v10  ;;  %v748_v21 = vand.u32 4294901760, %v109_v13  ;;  %v105_v42 = vld [vmem:[#allocation8 + $0x20] sm:$0xff]  ;;  %v104_v48 = vld [vmem:[#allocation8 + $0x18] sm:$0xff]  ;;  %v103_v54 = vld [vmem:[#allocation8 + $0x10] sm:$0xff] }
  0x13   :  { %120 = vmatpush.msra.mxu0 %v729_v4  ;;  %273 = vmatpush.msra.mxu2 %v167_v14  ;;  %v751_v22 = vand.u32 4294901760, %v167_v14  ;;  %v753_v23 = vand.u32 4294901760, %v173_v15  ;;  %v197_v25 = vsub.f32 %v111_v8, %v737_v11  ;;  %v203_v28 = vsub.f32 %v110_v12, %v744_v17  ;;  %v102_v60 = vld [vmem:[#allocation8 + $0x8] sm:$0xff]  ;;  %v101_v2 = vld [vmem:[#allocation8] sm:$0xff] }
  0x14   :  { %v755_v24 = vand.u32 4294901760, %v179_v16  ;;  %333 = vmatpush.msra.mxu3 %v729_v4  ;;  %v759_v27 = vand.u32 4294901760, %v185_v19  ;;  %v762_v29 = vand.u32 4294901760, %v108_v18  ;;  %v768_v33 = vand.u32 4294901760, %v191_v20 }
  0x15   :  { %122 = vmatpush.msra.mxu0 %v731_v5  ;;  %276 = vmatpush.msra.mxu2 %v173_v15  ;;  %v169_v30 = vsub.f32 %v167_v14, %v751_v22  ;;  %v175_v31 = vsub.f32 %v173_v15, %v753_v23  ;;  %v209_v34 = vsub.f32 %v109_v13, %v748_v21  ;;  %v772_v35 = vand.u32 4294901760, %v107_v26 }
  0x16   :  { %v181_v32 = vsub.f32 %v179_v16, %v755_v24  ;;  %335 = vmatpush.msra.mxu3 %v731_v5  ;;  %v187_v39 = vsub.f32 %v185_v19, %v759_v27  ;;  %v776_v40 = vand.u32 4294901760, %v197_v25  ;;  %v779_v41 = vand.u32 4294901760, %v203_v28 }
  0x17   :  { %124 = vmatpush.msra.mxu0 %v733_v9  ;;  %279 = vmatpush.msra.mxu2 %v179_v16  ;;  %v170_v37 = vand.u32 4294901760, %v169_v30  ;;  %v176_v38 = vand.u32 4294901760, %v175_v31  ;;  %v193_v44 = vsub.f32 %v191_v20, %v768_v33  ;;  %v215_v45 = vsub.f32 %v108_v18, %v762_v29 }
  0x18   :  { %337 = vmatpush.msra.mxu3 %v733_v9  ;;  %v182_v43 = vand.u32 4294901760, %v181_v32  ;;  %v784_v46 = vand.u32 4294901760, %v106_v36  ;;  %v787_v47 = vand.u32 4294901760, %v209_v34  ;;  %v188_v49 = vand.u32 4294901760, %v187_v39 }
  0x19   :  { %126 = vmatpush.msra.mxu0 %v735_v10  ;;  %171 = vmatpush.msra.mxu1 %v170_v37  ;;  %v199_v50 = vsub.f32 %v197_v25, %v776_v40  ;;  %v221_v51 = vsub.f32 %v107_v26, %v772_v35  ;;  %v792_v52 = vand.u32 4294901760, %v105_v42  ;;  %v205_v53 = vsub.f32 %v203_v28, %v779_v41 }
  0x1a   :  { %282 = vmatpush.msra.mxu2 %v185_v19  ;;  %339 = vmatpush.msra.mxu3 %v735_v10  ;;  %v194_v55 = vand.u32 4294901760, %v193_v44  ;;  %v227_v56 = vsub.f32 %v106_v36, %v784_v46  ;;  %v798_v57 = vand.u32 4294901760, %v104_v48  ;;  %v800_v58 = vand.u32 4294901760, %v215_v45 }
  0x1b   :  { %128 = vmatpush.msra.mxu0 %v737_v11  ;;  %177 = vmatpush.msra.mxu1 %v176_v38  ;;  %v211_v59 = vsub.f32 %v209_v34, %v787_v47  ;;  %v200_v61 = vand.u32 4294901760, %v199_v50  ;;  %v233_v62 = vsub.f32 %v105_v42, %v792_v52  ;;  %v806_v63 = vand.u32 4294901760, %v103_v54  ;;  %v843_v38 = vld [vmem:[#allocation3] sm:$0xff] }
  0x1c   :  { %285 = vmatpush.msra.mxu2 %v191_v20  ;;  %341 = vmatpush.msra.mxu3 %v737_v11  ;;  %v808_v0 = vand.u32 4294901760, %v221_v51  ;;  %v206_v1 = vand.u32 4294901760, %v205_v53  ;;  %v217_v6 = vsub.f32 %v215_v45, %v800_v58  ;;  %v239_v7 = vsub.f32 %v104_v48, %v798_v57 }
  0x1d   :  { %130 = vmatpush.msra.mxu0 %v744_v17  ;;  %183 = vmatpush.msra.mxu1 %v182_v43  ;;  %v814_v8 = vand.u32 4294901760, %v102_v60  ;;  %v816_v12 = vand.u32 4294901760, %v227_v56  ;;  %v212_v13 = vand.u32 4294901760, %v211_v59  ;;  %v245_v15 = vsub.f32 %v103_v54, %v806_v63 }
  0x1e   :  { %288 = vmatpush.msra.mxu2 %v197_v25  ;;  %343 = vmatpush.msra.mxu3 %v744_v17  ;;  %v223_v14 = vsub.f32 %v221_v51, %v808_v0  ;;  %v822_v16 = vand.u32 4294901760, %v101_v2  ;;  %v824_v18 = vand.u32 4294901760, %v233_v62  ;;  %v218_v19 = vand.u32 4294901760, %v217_v6 }
  0x1f   :  { %132 = vmatpush.msra.mxu0 %v748_v21  ;;  %189 = vmatpush.msra.mxu1 %v188_v49  ;;  %v229_v20 = vsub.f32 %v227_v56, %v816_v12  ;;  %v251_v25 = vsub.f32 %v102_v60, %v814_v8  ;;  %v830_v26 = vand.u32 4294901760, %v239_v7  ;;  %v836_v32 = vand.u32 4294901760, %v245_v15 }
  0x20   :  { %291 = vmatpush.msra.mxu2 %v203_v28  ;;  %345 = vmatpush.msra.mxu3 %v748_v21  ;;  %v224_v28 = vand.u32 4294901760, %v223_v14  ;;  %v235_v30 = vsub.f32 %v233_v62, %v824_v18  ;;  %v257_v31 = vsub.f32 %v101_v2, %v822_v16  ;;  %v852_v44 = vand.u32 4294901760, %v843_v38 }
  0x21   :  { %134 = vmatpush.msra.mxu0 %v762_v29  ;;  %195 = vmatpush.msra.mxu1 %v194_v55  ;;  %v241_v36 = vsub.f32 %v239_v7, %v830_v26  ;;  %v841_v37 = vand.u32 4294901760, %v251_v25  ;;  %v247_v42 = vsub.f32 %v245_v15, %v836_v32  ;;  %v865_v55 = vld [vmem:[#allocation3 + $0x8] sm:$0xff] }
  0x22   :  { %294 = vmatpush.msra.mxu2 %v209_v34  ;;  %347 = vmatpush.msra.mxu3 %v762_v29  ;;  %v230_v34 = vand.u32 4294901760, %v229_v20  ;;  %v236_v39 = vand.u32 4294901760, %v235_v30  ;;  %v848_v43 = vand.u32 4294901760, %v257_v31  ;;  %v873_v59 = vand.u32 4294901760, %v865_v55 }
  0x23   :  { %136 = vmatpush.msra.mxu0 %v772_v35  ;;  %201 = vmatpush.msra.mxu1 %v200_v61  ;;  %v253_v48 = vsub.f32 %v251_v25, %v841_v37  ;;  %v248_v49 = vand.u32 4294901760, %v247_v42  ;;  %v690_v20 = vmov 0.0  }
  0x24   :  { %297 = vmatpush.msra.mxu2 %v215_v45  ;;  %349 = vmatpush.msra.mxu3 %v772_v35  ;;  %v242_v45 = vand.u32 4294901760, %v241_v36  ;;  %v259_v50 = vsub.f32 %v257_v31, %v848_v43  ;;  %82 = vst.msk [vmem:[#allocation2] sm:$0x1] %vm81_vm0, %v690_v20 }
  0x25   :  { %138 = vmatpush.msra.mxu0 %v784_v46  ;;  %207 = vmatpush.msra.mxu1 %v206_v1  ;;  %v254_v53 = vand.u32 4294901760, %v253_v48 }
  0x26   :  { %300 = vmatpush.msra.mxu2 %v221_v51  ;;  %351 = vmatpush.msra.mxu3 %v784_v46  ;;  %v150_v51 = vsub.f32 %v843_v38, %v852_v44  ;;  %v260_v54 = vand.u32 4294901760, %v259_v50 }
  0x27   :  { %140 = vmatpush.msra.mxu0 %v792_v52  ;;  %213 = vmatpush.msra.mxu1 %v212_v13 }
  0x28   :  { %303 = vmatpush.msra.mxu2 %v227_v56  ;;  %353 = vmatpush.msra.mxu3 %v792_v52  ;;  %v151_v56 = vand.u32 4294901760, %v150_v51 }
  0x29   :  { %142 = vmatpush.msra.mxu0 %v798_v57  ;;  %219 = vmatpush.msra.mxu1 %v218_v19 }
  0x2a   :  { %306 = vmatpush.msra.mxu2 %v233_v62  ;;  %355 = vmatpush.msra.mxu3 %v798_v57 }
  0x2b   :  { %144 = vmatpush.msra.mxu0 %v806_v63  ;;  %225 = vmatpush.msra.mxu1 %v224_v28  ;;  %v495_v48 = vld [vmem:[#allocation2] sm:$0x1] }
  0x2c   :  { %309 = vmatpush.msra.mxu2 %v239_v7  ;;  %357 = vmatpush.msra.mxu3 %v806_v63 }
  0x2d   :  { %146 = vmatpush.msra.mxu0 %v814_v8  ;;  %231 = vmatpush.msra.mxu1 %v230_v34 }
  0x2e   :  { %312 = vmatpush.msra.mxu2 %v245_v15  ;;  %359 = vmatpush.msra.mxu3 %v814_v8 }
  0x2f   :  { %148 = vmatpush.msra.mxu0 %v822_v16  ;;  %237 = vmatpush.msra.mxu1 %v236_v39 }
  0x30   :  { %315 = vmatpush.msra.mxu2 %v251_v25  ;;  %361 = vmatpush.msra.mxu3 %v822_v16 }
  0x31   :  { %378 = vmatpush.msrb.mxu0 %v751_v22  ;;  %243 = vmatpush.msra.mxu1 %v242_v45 }
  0x32   :  { %318 = vmatpush.msra.mxu2 %v257_v31  ;;  %556 = vmatpush.msrb.mxu3 %v727_v3 }
  0x33   :  { %382 = vmatpush.msrb.mxu0 %v753_v23  ;;  %249 = vmatpush.msra.mxu1 %v248_v49 }
  0x34   :  { %540 = vmatpush.msrb.mxu2 %v751_v22  ;;  %557 = vmatpush.msrb.mxu3 %v729_v4  ;;  %v152_v22 = vsub.f32 %v150_v51, %v151_v56 }
  0x35   :  { %386 = vmatpush.msrb.mxu0 %v755_v24  ;;  %255 = vmatpush.msra.mxu1 %v254_v53 }
  0x36   :  { %541 = vmatpush.msrb.mxu2 %v753_v23  ;;  %558 = vmatpush.msrb.mxu3 %v731_v5  ;;  %v158_v23 = vsub.f32 %v865_v55, %v873_v59 }
  0x37   :  { %390 = vmatpush.msrb.mxu0 %v759_v27  ;;  %261 = vmatpush.msra.mxu1 %v260_v54 }
  0x38   :  { %542 = vmatpush.msrb.mxu2 %v755_v24  ;;  %559 = vmatpush.msrb.mxu3 %v733_v9 }
  0x39   :  { %394 = vmatpush.msrb.mxu0 %v768_v33  ;;  %449 = vmatpush.msrb.mxu1 %v727_v3  ;;  %v153_v3 = vand.u32 4294901760, %v152_v22 }
  0x3a   :  { %543 = vmatpush.msrb.mxu2 %v759_v27  ;;  %560 = vmatpush.msrb.mxu3 %v735_v10 }
  0x3b   :  { %398 = vmatpush.msrb.mxu0 %v776_v40  ;;  %451 = vmatpush.msrb.mxu1 %v729_v4  ;;  %v159_v4 = vand.u32 4294901760, %v158_v23 }
  0x3c   :  { %544 = vmatpush.msrb.mxu2 %v768_v33  ;;  %561 = vmatpush.msrb.mxu3 %v737_v11 }
  0x3d   :  { %402 = vmatpush.msrb.mxu0 %v779_v41  ;;  %453 = vmatpush.msrb.mxu1 %v731_v5  ;;  %v160_v5 = vsub.f32 %v158_v23, %v159_v4 }
  0x3e   :  { %545 = vmatpush.msrb.mxu2 %v776_v40  ;;  %154 = vmatmul.f32.vlgmr.msra.gmra.mxu0 %v153_v3 }
  0x3f   :  { %406 = vmatpush.msrb.mxu0 %v787_v47  ;;  %455 = vmatpush.msrb.mxu1 %v733_v9  ;;  %v161_v9 = vand.u32 4294901760, %v160_v5 }
  0x40   :  { %546 = vmatpush.msrb.mxu2 %v779_v41  ;;  %562 = vmatpush.msrb.mxu3 %v744_v17 }
  0x41   :  { %457 = vmatpush.msrb.mxu1 %v735_v10  ;;  %410 = vmatpush.msrb.mxu0 %v800_v58  ;;  %v85_v10 = vld [vmem:[#allocation6] sm:$0xff] }
  0x42   :  { %547 = vmatpush.msrb.mxu2 %v787_v47  ;;  %563 = vmatpush.msrb.mxu3 %v748_v21 }
  0x43   :  { %321 = vmatmul.f32.vlgmr.msra.gmra.mxu2 %v150_v51  ;;  %414 = vmatpush.msrb.mxu0 %v808_v0 }
  0x44   :  { %548 = vmatpush.msrb.mxu2 %v800_v58  ;;  %459 = vmatpush.msrb.mxu1 %v737_v11  ;;  %v88_v11 = vsub.f32 %v843_v38, %v85_v10 }
  0x45   :  { %365 = vmatmul.f32.vlgmr.msra.gmra.mxu3 %v151_v56  ;;  %418 = vmatpush.msrb.mxu0 %v816_v12 }
  0x46   :  { %549 = vmatpush.msrb.mxu2 %v808_v0  ;;  %461 = vmatpush.msrb.mxu1 %v744_v17  ;;  %v90_v17 = vmul.f32 %v88_v11, %v88_v11 }
  0x47   :  { %564 = vmatpush.msrb.mxu3 %v762_v29  ;;  %263 = vmatmul.f32.vlgmr.msra.gmra.mxu1 %v852_v44 }
  0x48   :  { %550 = vmatpush.msrb.mxu2 %v816_v12  ;;  %422 = vmatpush.msrb.mxu0 %v824_v18 }
  0x49   :  { %463 = vmatpush.msrb.mxu1 %v748_v21  ;;  %565 = vmatpush.msrb.mxu3 %v772_v35  ;;  %v582_v21 = vld [vmem:[%s951_s2] ss:$0 sm:$0xff]  ;;  %s692_s2 = smov [#allocation9]  }
  0x4a   :  { %162 = vmatmul.f32.gmra.mxu0 %v161_v9  ;;  %551 = vmatpush.msrb.mxu2 %v824_v18  ;;  %v95_v24 = vmul.f32 %v582_v21, %v90_v17  ;;  %s527_s5 = sshll.u32 %s692_s2, 4  ;;  %s528_s5 = int_to_ptr.vmem [resolvable:$true] %s527_s5 }
  0x4b   :  { %426 = vmatpush.msrb.mxu0 %v830_v26  ;;  %465 = vmatpush.msrb.mxu1 %v762_v29  ;;  %v86_v29 = vld [vmem:[#allocation6 + $0x8] sm:$0xff] }
  0x4c   :  { %566 = vmatpush.msrb.mxu3 %v784_v46  ;;  %326 = vmatmul.f32.gmra.mxu2 %v158_v23  ;;  %v89_v33 = vsub.f32 %v865_v55, %v86_v29 }
  0x4d   :  { %552 = vmatpush.msrb.mxu2 %v830_v26  ;;  %430 = vmatpush.msrb.mxu0 %v836_v32  ;;  %v691_v26 = vmov 0  }
  0x4e   :  { %467 = vmatpush.msrb.mxu1 %v772_v35  ;;  %567 = vmatpush.msrb.mxu3 %v792_v52  ;;  %v91_v35 = vmul.f32 %v89_v33, %v89_v33 }
  0x4f   :  { %371 = vmatmul.f32.gmra.mxu3 %v159_v4  ;;  %553 = vmatpush.msrb.mxu2 %v836_v32 }
  0x50   :  { %434 = vmatpush.msrb.mxu0 %v841_v37  ;;  %469 = vmatpush.msrb.mxu1 %v784_v46  ;;  %v96_v46 = vmul.f32 %v582_v21, %v91_v35 }
  0x51   :  { %568 = vmatpush.msrb.mxu3 %v798_v57  ;;  %267 = vmatmul.f32.gmra.mxu1 %v873_v59 }
  0x52   :  { %554 = vmatpush.msrb.mxu2 %v841_v37  ;;  %438 = vmatpush.msrb.mxu0 %v848_v43 }
  0x53   :  { %471 = vmatpush.msrb.mxu1 %v792_v52  ;;  %569 = vmatpush.msrb.mxu3 %v806_v63 }
  0x54   :  { %440 = vmatmul.f32.vlgmr.msrb.gmra.mxu0 %v852_v44  ;;  %555 = vmatpush.msrb.mxu2 %v848_v43 }
  0x55   :  { %473 = vmatpush.msrb.mxu1 %v798_v57  ;;  %570 = vmatpush.msrb.mxu3 %v814_v8 }
  0x56   :  { %444 = vmatmul.f32.vlgmr.msrb.gmra.mxu2 %v873_v59  ;;  %97 = vadd.xlane.f32.xlu1 %v95_v24 }
  0x57   :  { %475 = vmatpush.msrb.mxu1 %v806_v63  ;;  %571 = vmatpush.msrb.mxu3 %v822_v16 }
  0x58   :  { %485 = vmatmul.f32.vlgmr.msrb.gmra.mxu3 %v873_v59  ;;  %580 = vset.pattern.permute.xlu2 %v691_v26 }
  0x59   :  { %477 = vmatpush.msrb.mxu1 %v814_v8  ;;  %581 = vset.pattern.permute.xlu0 %v691_v26 }
  0x5b   :  { %479 = vmatpush.msrb.mxu1 %v822_v16 }
  0x5c   :  { %481 = vmatmul.f32.vlgmr.msrb.gmra.mxu1 %v852_v44 }
  0x5e   :  { %99 = vadd.xlane.f32.xlu1 %v96_v46 }
  0xbb   :  { %v155_v27 = vpop.f32.mrf.mxu0 }
  0xc4   :  { %v264_v40 = vpop.f32.mrf.mxu1 }
  0xc5   :  { %v265_v57 = vadd.f32 %v264_v40, %v155_v27 }
  0xc6   :  { %v322_v41 = vpop.f32.mrf.mxu2 }
  0xc7   :  { %v163_v52 = vpop.f32.mrf.mxu0  ;;  %v323_v61 = vadd.f32 %v322_v41, %v265_v57 }
  0xc8   :  { %v366_v47 = vpop.f32.mrf.mxu3 }
  0xc9   :  { %v367_v1 = vadd.f32 %v366_v47, %v323_v61  ;;  %v98_v25 = vpop.xlane.xlu1 %97 }
  0xce   :  { %v268_v58 = vpop.f32.mrf.mxu1 }
  0xcf   :  { %v327_v60 = vpop.f32.mrf.mxu2  ;;  %v269_v62 = vadd.f32 %v268_v58, %v163_v52 }
  0xd1   :  { %v441_v0 = vpop.f32.mrf.mxu0  ;;  %v328_v2 = vadd.f32 %v327_v60, %v269_v62  ;;  %v100_v32 = vpop.xlane.xlu1 %99 }
  0xd2   :  { %v372_v63 = vpop.f32.mrf.mxu3  ;;  %v442_v6 = vadd.f32 %v441_v0, %v367_v1 }
  0xd3   :  { %v373_v12 = vadd.f32 %v372_v63, %v328_v2 }
  0xd9   :  { %v445_v7 = vpop.f32.mrf.mxu2  ;;  %v482_v8 = vpop.f32.mrf.mxu1 }
  0xda   :  { %v483_v13 = vadd.f32 %v482_v8, %v442_v6  ;;  %v446_v14 = vadd.f32 %v445_v7, %v373_v12 }
  0xdb   :  { %v486_v16 = vpop.f32.mrf.mxu3 }
  0xdc   :  { %v489_v15 = vmul.f32 %v483_v13, %v483_v13  ;;  %v487_v18 = vadd.f32 %v486_v16, %v446_v14 }
  0xde   :  { %491 = vadd.xlane.f32.xlu0 %v489_v15  ;;  %v490_v19 = vmul.f32 %v487_v18, %v487_v18 }
  0xe6   :  { %493 = vadd.xlane.f32.xlu0 %v490_v19 }
 0x151   :  { %v492_v28 = vpop.xlane.xlu0 %491 }
 0x152   :  { %v496_v30 = vmul.f32 0.25, %v492_v28 }
 0x154   :  { %v498_v36 = vadd.f32 %v496_v30, %v98_v25 }
 0x159   :  { %v494_v31 = vpop.xlane.xlu0 %493 }
 0x15a   :  { %v497_v34 = vmul.f32 0.25, %v494_v31 }
 0x15c   :  { %v499_v37 = vadd.f32 %v497_v34, %v100_v32 }
 0x15e   :  { %v500_v38 = vadd.f32 %v499_v37, %v498_v36 }
 0x160   :  { %v501_v39 = vrot.slane %v500_v38, 4 }
 0x162   :  { %v502_v42 = vadd.f32 %v501_v39, %v500_v38 }
 0x164   :  { %v503_v43 = vrot.slane %v502_v42, 2 }
 0x166   :  { %v504_v44 = vadd.f32 %v503_v43, %v502_v42 }
 0x168   :  { %v505_v45 = vrot.slane %v504_v44, 1 }
 0x16a   :  { %v506_v49 = vadd.f32 %v505_v45, %v504_v44 }
 0x16c   :  { %v507_v50 = vadd.f32 %v506_v49, %v495_v48 }
 0x16e   :  { %509 = vst.msk [vmem:[#allocation2] sm:$0x1] %vm81_vm0, %v507_v50 }
 0x175   :  { %v513_v51 = vld [vmem:[#allocation2] sm:$0x1] }
 0x176   :  { %v514_v53 = vmul.f32 0.125, %v513_v51 }
 0x178   :  { %v516_v54 = vperm.slane %v514_v53, 0 }
 0x17a   :  { %518 = vperm.xlu2 %580, %v516_v54  }
 0x1d4   :  { %v519_v55 = vpop.permute.xlu2 %518 }
 0x1d5   :  { %521 = vst [vmem:[#allocation9] sm:$0xff] %v519_v55 }
 0x1d6   :  { %532 = dma.vmem_to_hbm [thread:$0]  %s528_s5, 128, %s530_s8, [#allocation5]  }
 0x1d7   :  { %683 = dma.done.wait [#allocation5], 128  }
 0x1d8   :  { %684 = vsyncadd [#allocation5], 4294967168 }
 0x1d9   :  { %537 = vsyncpa [#allocation4], 1 }
 0x1da   :  { %538 = vsyncpa [#allocation7], 1 }
 0x1db   :  { %539 = vsyncpa [#allocation5], 1 }

</bundles_post_ra>
